<compile_context>
chip_gen: v7x
topology: tpu7x:2x2x1
jax: 0.10.0
libtpu: 0.0.40
codegen_flags: <defaults>
</compile_context>

<pallas_src>
import jax
import jax.numpy as jnp
from jax.experimental import pallas as pl
from jax.experimental.pallas import tpu as pltpu

BN_EPS = 1e-5


def _choose_m_tile(m):
    """Largest tile (<= 8192) that divides m exactly; None if m is ragged."""
    for tm in (8192, 4096, 2048, 1024, 512, 256, 128, 64, 32, 16, 8):
        if m % tm == 0:
            return tm
    return None


# ----------------------------------------------------------------------------
# Kernel 1: tiled conv matmul (bf16 -> f32 accum -> bf16 out) + per-tile BN
# partial statistics.  Grid over M tiles, "parallel" (no cross-tile state).
#   p_ref    : (TM, K)      bf16 im2col patch tile
#   w_ref    : (K, C)       bf16 reshaped conv weights (resident across tiles)
#   conv_ref : (TM, C)      bf16 conv output tile
#   psum_ref : (1, 1, C)    f32 per-tile channel sum
#   psq_ref  : (1, 1, C)    f32 per-tile channel sum of squares
# ----------------------------------------------------------------------------
def conv_stats_kernel(p_ref, w_ref, conv_ref, psum_ref, psq_ref):
    acc = jnp.dot(p_ref[...], w_ref[...], preferred_element_type=jnp.float32)
    conv_ref[...] = acc.astype(conv_ref.dtype)
    # Partial stats from the f32 accumulator (before the bf16 cast).  Padded zero
    # rows (ragged-M fallback only) contribute nothing to either sum.
    psum_ref[...] = jnp.sum(acc, axis=0, keepdims=True).reshape(psum_ref.shape)
    psq_ref[...] = jnp.sum(acc * acc, axis=0, keepdims=True).reshape(psq_ref.shape)


# ----------------------------------------------------------------------------
# Kernel 2: fused BN-apply + ReLU + 3x3 stride-2 max pool (one image per step).
#   conv_ref  : (1, OH, OW, C)  bf16 raw conv for this image
#   scale_ref : (1, C)          f32 BN scale  (gamma * rsqrt(var + eps))
#   shift_ref : (1, C)          f32 BN shift  (beta - mean * scale)
#   o_ref     : (1, POH, POW, C) f32
#   pad_ref   : (1, OH+2, OW+2, C)  VMEM scratch (border-zeroed activations)
#   wpool_ref : (1, OH+2, POW, C)   VMEM scratch (W-direction pooled)
# NOTE: the zero border is only a valid max-pool identity because ReLU guarantees
# activations >= 0 and every 3x3/s2/p1 window contains an in-bounds pixel.  If the
# ReLU is removed or the pool padding changes, this must become -inf padding.
# ----------------------------------------------------------------------------
def bn_relu_pool_kernel(conv_ref, scale_ref, shift_ref, o_ref,
                        pad_ref, wpool_ref):
    oh = conv_ref.shape[1]
    ow = conv_ref.shape[2]
    c = conv_ref.shape[3]
    poh = o_ref.shape[1]
    pow_ = o_ref.shape[2]

    scale = scale_ref[...].reshape(1, 1, 1, c)
    shift = shift_ref[...].reshape(1, 1, 1, c)
    y = jnp.maximum(conv_ref[...].astype(jnp.float32) * scale + shift, 0.0)

    # Zero only the 1-pixel border (interior is fully overwritten below).
    zrow = jnp.zeros((1, 1, ow + 2, c), jnp.float32)
    zcol = jnp.zeros((1, oh + 2, 1, c), jnp.float32)
    pad_ref[:, 0:1, :, :] = zrow
    pad_ref[:, oh + 1:oh + 2, :, :] = zrow
    pad_ref[:, :, 0:1, :] = zcol
    pad_ref[:, :, ow + 1:ow + 2, :] = zcol
    pad_ref[:, 1:oh + 1, 1:ow + 1, :] = y

    # Pool along W: 3 strided whole-plane reads + 2 VPU maxes.
    wmax = pad_ref[:, :, pl.ds(0, pow_, stride=2), :]
    wmax = jnp.maximum(wmax, pad_ref[:, :, pl.ds(1, pow_, stride=2), :])
    wmax = jnp.maximum(wmax, pad_ref[:, :, pl.ds(2, pow_, stride=2), :])
    wpool_ref[...] = wmax

    # Pool along H: 3 strided whole-plane reads + 2 VPU maxes.
    hmax = wpool_ref[:, pl.ds(0, poh, stride=2), :, :]
    hmax = jnp.maximum(hmax, wpool_ref[:, pl.ds(1, poh, stride=2), :, :])
    hmax = jnp.maximum(hmax, wpool_ref[:, pl.ds(2, poh, stride=2), :, :])
    o_ref[...] = hmax


# ----------------------------------------------------------------------------
# Wrapper (NCHW in, NCHW out)
# ----------------------------------------------------------------------------
@jax.jit
def stem_forward(x_nchw, w_oihw, gamma, beta):
    N, Cin, H, W = x_nchw.shape
    Cout, _, KH, KW = w_oihw.shape
    stride, pad = 2, 3
    OH = (H + 2 * pad - KH) // stride + 1
    OW = (W + 2 * pad - KW) // stride + 1
    POH = (OH + 2 - 3) // 2 + 1
    POW = (OW + 2 - 3) // 2 + 1

    M = N * OH * OW
    K = KH * KW * Cin

    # --- glue: NCHW -> NHWC (bf16), zero pad, im2col patches (kh, kw, cin) ---
    # Cast to bf16 *before* the gather so the duplicated tensor moves half the bytes.
    x = jnp.transpose(x_nchw, (0, 2, 3, 1)).astype(jnp.bfloat16)
    xpad = jnp.pad(x, ((0, 0), (pad, pad), (pad, pad), (0, 0)))
    patches = [xpad[:, kh:kh + stride * OH:stride, kw:kw + stride * OW:stride, :]
               for kh in range(KH) for kw in range(KW)]   # each (N, OH, OW, Cin)
    P = jnp.stack(patches, axis=3).reshape(M, K)
    W2 = jnp.transpose(w_oihw, (2, 3, 1, 0)).reshape(K, Cout).astype(jnp.bfloat16)

    TM = _choose_m_tile(M)
    if TM is None:
        # Ragged M (odd spatial sizes): pad up to a tile multiple.  Zero rows are
        # exact no-ops for the matmul and the BN sums (we divide by the real M).
        TM = 256
        Mpad = TM * pl.cdiv(M, TM)
        P = jnp.concatenate([P, jnp.zeros((Mpad - M, K), P.dtype)], axis=0)
    else:
        Mpad = M
    n_tiles = Mpad // TM

    conv, psum, psq = pl.pallas_call(
        conv_stats_kernel,
        out_shape=(
            jax.ShapeDtypeStruct((Mpad, Cout), jnp.bfloat16),
            jax.ShapeDtypeStruct((n_tiles, 1, Cout), jnp.float32),
            jax.ShapeDtypeStruct((n_tiles, 1, Cout), jnp.float32),
        ),
        grid=(n_tiles,),
        in_specs=[
            pl.BlockSpec((TM, K), lambda i: (i, 0)),
            pl.BlockSpec((K, Cout), lambda i: (0, 0)),
        ],
        out_specs=(
            pl.BlockSpec((TM, Cout), lambda i: (i, 0)),
            pl.BlockSpec((1, 1, Cout), lambda i: (i, 0, 0)),
            pl.BlockSpec((1, 1, Cout), lambda i: (i, 0, 0)),
        ),
        compiler_params=pltpu.CompilerParams(
            dimension_semantics=("parallel",)),   # no cross-tile state -> both TCs on v7x
        cost_estimate=pl.CostEstimate(
            flops=2 * Mpad * K * Cout,
            transcendentals=0,
            bytes_accessed=(Mpad * K * 2 + K * Cout * 2
                            + Mpad * Cout * 2 + n_tiles * Cout * 8)),
    )(P, W2)

    # --- tiny XLA epilogue: fold per-tile partials into BN scale/shift (2*C*n_tiles
    # floats).  NOTE: E[x^2] - mean^2 in f32 can cancel when |mean| >> std; fine for
    # the zero-mean-ish stem conv, revisit if reused elsewhere. ---
    mean = jnp.sum(psum, axis=(0, 1)) / M
    var = jnp.maximum(jnp.sum(psq, axis=(0, 1)) / M - mean * mean, 0.0)
    inv_std = jax.lax.rsqrt(var + BN_EPS)
    scale_vec = gamma.astype(jnp.float32) * inv_std
    shift_vec = beta.astype(jnp.float32) - mean * scale_vec
    scale2 = scale_vec.reshape(1, Cout)
    shift2 = shift_vec.reshape(1, Cout)

    if Mpad != M:
        conv = conv[:M]          # slow path, ragged shapes only
    conv4 = conv.reshape(N, OH, OW, Cout)   # contiguous reshape: no copy

    pooled = pl.pallas_call(
        bn_relu_pool_kernel,
        out_shape=jax.ShapeDtypeStruct((N, POH, POW, Cout), jnp.float32),
        grid=(N,),
        in_specs=[
            pl.BlockSpec((1, OH, OW, Cout), lambda n: (n, 0, 0, 0)),
            pl.BlockSpec((1, Cout), lambda n: (0, 0)),
            pl.BlockSpec((1, Cout), lambda n: (0, 0)),
        ],
        out_specs=pl.BlockSpec((1, POH, POW, Cout), lambda n: (n, 0, 0, 0)),
        scratch_shapes=[
            pltpu.VMEM((1, OH + 2, OW + 2, Cout), jnp.float32),
            pltpu.VMEM((1, OH + 2, POW, Cout), jnp.float32),
        ],
        compiler_params=pltpu.CompilerParams(
            dimension_semantics=("parallel",)),
        cost_estimate=pl.CostEstimate(
            flops=8 * N * OH * OW * Cout,
            transcendentals=0,
            bytes_accessed=N * OH * OW * Cout * 2 + N * POH * POW * Cout * 4),
    )(conv4, scale2, shift2)

    return jnp.transpose(pooled, (0, 3, 1, 2))  # back to NCHW


# ----------------------------------------------------------------------------
# Pure-JAX reference.  It mirrors the kernel's precision choices (bf16 matmul
# inputs, f32 accumulation, f32 batch stats, bf16 conv intermediate for the
# BN/ReLU/pool path) so the comparison stays tight.
# ----------------------------------------------------------------------------
def stem_reference(x_nchw, w_oihw, gamma, beta):
    x = jnp.transpose(x_nchw, (0, 2, 3, 1)).astype(jnp.bfloat16)
    w_hwio = jnp.transpose(w_oihw, (2, 3, 1, 0)).astype(jnp.bfloat16)
    conv = jax.lax.conv_general_dilated(
        x, w_hwio, window_strides=(2, 2), padding=((3, 3), (3, 3)),
        dimension_numbers=("NHWC", "HWIO", "NHWC"),
        preferred_element_type=jnp.float32)
    mean = jnp.mean(conv, axis=(0, 1, 2), keepdims=True)
    var = jnp.mean((conv - mean) ** 2, axis=(0, 1, 2), keepdims=True)
    conv_bf16 = conv.astype(jnp.bfloat16).astype(jnp.float32)
    y = (conv_bf16 - mean) * jax.lax.rsqrt(var + BN_EPS) * gamma + beta
    y = jnp.maximum(y, 0.0)
    pooled = jax.lax.reduce_window(
        y, -jnp.inf, jax.lax.max, window_dimensions=(1, 3, 3, 1),
        window_strides=(1, 2, 2, 1),
        padding=((0, 0), (1, 1), (1, 1), (0, 0)))
    return jnp.transpose(pooled, (0, 3, 1, 2))


if __name__ == "__main__":
    key = jax.random.PRNGKey(0)
    k_x, k_w = jax.random.split(key)

    # Small shapes consistent with the module (conv1 requires 3 input channels).
    N, Cin, H, W = 2, 3, 16, 16
    Cout, KH, KW = 64, 7, 7

    x = jax.random.normal(k_x, (N, Cin, H, W), dtype=jnp.float32)

    # Deterministic kaiming_uniform_(a=1)-style init: gain = sqrt(2/(1+1)) = 1.
    fan_in = Cin * KH * KW
    bound = (3.0 / fan_in) ** 0.5
    w = jax.random.uniform(k_w, (Cout, Cin, KH, KW), dtype=jnp.float32,
                           minval=-bound, maxval=bound)
    gamma = jnp.ones((Cout,), dtype=jnp.float32)   # BatchNorm default weight
    beta = jnp.zeros((Cout,), dtype=jnp.float32)   # BatchNorm default bias

    out = stem_forward(x, w, gamma, beta)
    out = jax.block_until_ready(out)

    ref = stem_reference(x, w, gamma, beta)
    assert out.shape == (N, Cout, 4, 4), out.shape
    # Tolerance budget: both sides use a bf16 conv intermediate (~2^-9 relative);
    # independent f32 accumulation order in the two conv paths can flip a bf16 ulp
    # (~4e-3 on unit-variance activations), hence 1e-2.
    max_err = float(jnp.max(jnp.abs(out - ref)))
    assert jnp.allclose(out, ref, atol=1e-2, rtol=1e-2), max_err

    print("KERNEL_OK")
</pallas_src>

<mosaic_0001>
module attributes {stable_mosaic.version = 11 : i64} {
  func.func @conv_stats_kernel(%arg0: i32, %arg1: memref<128x147xbf16, #tpu.memory_space<vmem>>, %arg2: memref<147x64xbf16, #tpu.memory_space<vmem>>, %arg3: memref<128x64xbf16, #tpu.memory_space<vmem>>, %arg4: memref<1x1x64xf32, #tpu.memory_space<vmem>>, %arg5: memref<1x1x64xf32, #tpu.memory_space<vmem>>) attributes {dimension_semantics = [#tpu.dimension_semantics<parallel>], iteration_bounds = array<i64: 1>, scalar_prefetch = 0 : i64, scratch_operands = 0 : i64, tpu.core_type = #tpu.core_type<tc>, window_params = [{transform_indices = @transform_0, window_bounds = array<i64: 128, 147>}, {pipeline_mode = #tpu.pipeline_mode<synchronous>, transform_indices = @transform_1, window_bounds = array<i64: 147, 64>}, {transform_indices = @transform_2, window_bounds = array<i64: 128, 64>}, {transform_indices = @transform_3, window_bounds = array<i64: 1, 1, 64>}, {transform_indices = @transform_4, window_bounds = array<i64: 1, 1, 64>}]} {
    %c0 = arith.constant 0 : index
    %c0_0 = arith.constant 0 : index
    %0 = vector.load %arg1[%c0, %c0_0] : memref<128x147xbf16, #tpu.memory_space<vmem>>, vector<128x147xbf16>
    %c0_1 = arith.constant 0 : index
    %c0_2 = arith.constant 0 : index
    %1 = vector.load %arg2[%c0_1, %c0_2] : memref<147x64xbf16, #tpu.memory_space<vmem>>, vector<147x64xbf16>
    %cst = arith.constant dense<0.000000e+00> : vector<128x64xf32>
    %2 = tpu.matmul %0, %1, %cst {dimension_numbers = #tpu.dot_dimension_numbers<[1], [0], [0], [1], [0, 0, 1, 1], [], []>} : vector<128x147xbf16>, vector<147x64xbf16>, vector<128x64xf32> -> vector<128x64xf32>
    %3 = arith.truncf %2 : vector<128x64xf32> to vector<128x64xbf16>
    %c0_3 = arith.constant 0 : index
    %c0_4 = arith.constant 0 : index
    %4 = vector.load %arg3[%c0_3, %c0_4] : memref<128x64xbf16, #tpu.memory_space<vmem>>, vector<128x64xbf16>
    tpu.vector_store %arg3[%c0_3, %c0_4], %3 {strides = array<i32>} : memref<128x64xbf16, #tpu.memory_space<vmem>>, vector<128x64xbf16>,
    %cst_5 = arith.constant dense<0.000000e+00> : vector<64xf32>
    %5 = vector.multi_reduction <add>, %2, %cst_5 [0] : vector<128x64xf32> to vector<64xf32>
    %6 = vector.shape_cast %5 : vector<64xf32> to vector<1x64xf32>
    %7 = vector.shape_cast %6 : vector<1x64xf32> to vector<1x1x64xf32>
    %c0_6 = arith.constant 0 : index
    %c0_7 = arith.constant 0 : index
    %c0_8 = arith.constant 0 : index
    %8 = vector.load %arg4[%c0_6, %c0_7, %c0_8] : memref<1x1x64xf32, #tpu.memory_space<vmem>>, vector<1x1x64xf32>
    tpu.vector_store %arg4[%c0_6, %c0_7, %c0_8], %7 {strides = array<i32>} : memref<1x1x64xf32, #tpu.memory_space<vmem>>, vector<1x1x64xf32>,
    %9 = arith.mulf %2, %2 : vector<128x64xf32>
    %cst_9 = arith.constant dense<0.000000e+00> : vector<64xf32>
    %10 = vector.multi_reduction <add>, %9, %cst_9 [0] : vector<128x64xf32> to vector<64xf32>
    %11 = vector.shape_cast %10 : vector<64xf32> to vector<1x64xf32>
    %12 = vector.shape_cast %11 : vector<1x64xf32> to vector<1x1x64xf32>
    %c0_10 = arith.constant 0 : index
    %c0_11 = arith.constant 0 : index
    %c0_12 = arith.constant 0 : index
    %13 = vector.load %arg5[%c0_10, %c0_11, %c0_12] : memref<1x1x64xf32, #tpu.memory_space<vmem>>, vector<1x1x64xf32>
    tpu.vector_store %arg5[%c0_10, %c0_11, %c0_12], %12 {strides = array<i32>} : memref<1x1x64xf32, #tpu.memory_space<vmem>>, vector<1x1x64xf32>,
    return
  }
  func.func @transform_0(%arg0: i32) -> (i32, i32) {
    %c0_i32 = arith.constant 0 : i32
    %c0_i32_0 = arith.constant 0 : i32
    return %arg0, %c0_i32 : i32, i32
  }
  func.func @transform_1(%arg0: i32) -> (i32, i32) {
    %c0_i32 = arith.constant 0 : i32
    %c0_i32_0 = arith.constant 0 : i32
    %c0_i32_1 = arith.constant 0 : i32
    return %c0_i32, %c0_i32_0 : i32, i32
  }
  func.func @transform_2(%arg0: i32) -> (i32, i32) {
    %c0_i32 = arith.constant 0 : i32
    %c0_i32_0 = arith.constant 0 : i32
    return %arg0, %c0_i32 : i32, i32
  }
  func.func @transform_3(%arg0: i32) -> (i32, i32, i32) {
    %c0_i32 = arith.constant 0 : i32
    %c0_i32_0 = arith.constant 0 : i32
    %c0_i32_1 = arith.constant 0 : i32
    return %arg0, %c0_i32, %c0_i32_0 : i32, i32, i32
  }
  func.func @transform_4(%arg0: i32) -> (i32, i32, i32) {
    %c0_i32 = arith.constant 0 : i32
    %c0_i32_0 = arith.constant 0 : i32
    %c0_i32_1 = arith.constant 0 : i32
    return %arg0, %c0_i32, %c0_i32_0 : i32, i32, i32
  }
}

module attributes {stable_mosaic.version = 11 : i64} {
  func.func @bn_relu_pool_kernel(%arg0: i32, %arg1: memref<1x8x8x64xbf16, #tpu.memory_space<vmem>>, %arg2: memref<1x64xf32, #tpu.memory_space<vmem>>, %arg3: memref<1x64xf32, #tpu.memory_space<vmem>>, %arg4: memref<1x4x4x64xf32, #tpu.memory_space<vmem>>, %arg5: memref<1x10x10x64xf32, #tpu.memory_space<vmem>>, %arg6: memref<1x10x4x64xf32, #tpu.memory_space<vmem>>) attributes {dimension_semantics = [#tpu.dimension_semantics<parallel>], iteration_bounds = array<i64: 2>, scalar_prefetch = 0 : i64, scratch_operands = 2 : i64, tpu.core_type = #tpu.core_type<tc>, window_params = [{transform_indices = @transform_0, window_bounds = array<i64: 1, 8, 8, 64>}, {pipeline_mode = #tpu.pipeline_mode<synchronous>, transform_indices = @transform_1, window_bounds = array<i64: 1, 64>}, {pipeline_mode = #tpu.pipeline_mode<synchronous>, transform_indices = @transform_2, window_bounds = array<i64: 1, 64>}, {transform_indices = @transform_3, window_bounds = array<i64: 1, 4, 4, 64>}]} {
    %c0 = arith.constant 0 : index
    %c0_0 = arith.constant 0 : index
    %0 = vector.load %arg2[%c0, %c0_0] : memref<1x64xf32, #tpu.memory_space<vmem>>, vector<1x64xf32>
    %1 = vector.shape_cast %0 : vector<1x64xf32> to vector<1x1x1x64xf32>
    %c0_1 = arith.constant 0 : index
    %c0_2 = arith.constant 0 : index
    %2 = vector.load %arg3[%c0_1, %c0_2] : memref<1x64xf32, #tpu.memory_space<vmem>>, vector<1x64xf32>
    %3 = vector.shape_cast %2 : vector<1x64xf32> to vector<1x1x1x64xf32>
    %c0_3 = arith.constant 0 : index
    %c0_4 = arith.constant 0 : index
    %c0_5 = arith.constant 0 : index
    %c0_6 = arith.constant 0 : index
    %4 = vector.load %arg1[%c0_3, %c0_4, %c0_5, %c0_6] : memref<1x8x8x64xbf16, #tpu.memory_space<vmem>>, vector<1x8x8x64xbf16>
    %5 = arith.extf %4 : vector<1x8x8x64xbf16> to vector<1x8x8x64xf32>
    %6 = vector.broadcast %1 : vector<1x1x1x64xf32> to vector<1x8x8x64xf32>
    %7 = arith.mulf %5, %6 : vector<1x8x8x64xf32>
    %8 = vector.broadcast %3 : vector<1x1x1x64xf32> to vector<1x8x8x64xf32>
    %9 = arith.addf %7, %8 : vector<1x8x8x64xf32>
    %cst = arith.constant 0.000000e+00 : f32
    %10 = vector.broadcast %cst : f32 to vector<1x8x8x64xf32>
    %11 = arith.maximumf %9, %10 : vector<1x8x8x64xf32>
    %cst_7 = arith.constant 0.000000e+00 : f32
    %12 = vector.broadcast %cst_7 : f32 to vector<1x1x10x64xf32>
    %cst_8 = arith.constant 0.000000e+00 : f32
    %13 = vector.broadcast %cst_8 : f32 to vector<1x10x1x64xf32>
    %c0_9 = arith.constant 0 : index
    %c0_10 = arith.constant 0 : index
    %c0_11 = arith.constant 0 : index
    %c0_12 = arith.constant 0 : index
    %14 = vector.load %arg5[%c0_9, %c0_10, %c0_11, %c0_12] : memref<1x10x10x64xf32, #tpu.memory_space<vmem>>, vector<1x1x10x64xf32>
    tpu.vector_store %arg5[%c0_9, %c0_10, %c0_11, %c0_12], %12 {strides = array<i32>} : memref<1x10x10x64xf32, #tpu.memory_space<vmem>>, vector<1x1x10x64xf32>,
    %c0_13 = arith.constant 0 : index
    %c9 = arith.constant 9 : index
    %c0_14 = arith.constant 0 : index
    %c0_15 = arith.constant 0 : index
    %15 = vector.load %arg5[%c0_13, %c9, %c0_14, %c0_15] : memref<1x10x10x64xf32, #tpu.memory_space<vmem>>, vector<1x1x10x64xf32>
    tpu.vector_store %arg5[%c0_13, %c9, %c0_14, %c0_15], %12 {strides = array<i32>} : memref<1x10x10x64xf32, #tpu.memory_space<vmem>>, vector<1x1x10x64xf32>,
    %c0_16 = arith.constant 0 : index
    %c0_17 = arith.constant 0 : index
    %c0_18 = arith.constant 0 : index
    %c0_19 = arith.constant 0 : index
    %16 = vector.load %arg5[%c0_16, %c0_17, %c0_18, %c0_19] : memref<1x10x10x64xf32, #tpu.memory_space<vmem>>, vector<1x10x1x64xf32>
    tpu.vector_store %arg5[%c0_16, %c0_17, %c0_18, %c0_19], %13 {strides = array<i32>} : memref<1x10x10x64xf32, #tpu.memory_space<vmem>>, vector<1x10x1x64xf32>,
    %c0_20 = arith.constant 0 : index
    %c0_21 = arith.constant 0 : index
    %c9_22 = arith.constant 9 : index
    %c0_23 = arith.constant 0 : index
    %17 = vector.load %arg5[%c0_20, %c0_21, %c9_22, %c0_23] : memref<1x10x10x64xf32, #tpu.memory_space<vmem>>, vector<1x10x1x64xf32>
    tpu.vector_store %arg5[%c0_20, %c0_21, %c9_22, %c0_23], %13 {strides = array<i32>} : memref<1x10x10x64xf32, #tpu.memory_space<vmem>>, vector<1x10x1x64xf32>,
    %c0_24 = arith.constant 0 : index
    %c1 = arith.constant 1 : index
    %c1_25 = arith.constant 1 : index
    %c0_26 = arith.constant 0 : index
    %18 = vector.load %arg5[%c0_24, %c1, %c1_25, %c0_26] : memref<1x10x10x64xf32, #tpu.memory_space<vmem>>, vector<1x8x8x64xf32>
    tpu.vector_store %arg5[%c0_24, %c1, %c1_25, %c0_26], %11 {strides = array<i32>} : memref<1x10x10x64xf32, #tpu.memory_space<vmem>>, vector<1x8x8x64xf32>,
    %c0_27 = arith.constant 0 : index
    %c0_28 = arith.constant 0 : index
    %c0_29 = arith.constant 0 : index
    %c0_30 = arith.constant 0 : index
    %19 = tpu.strided_load %arg5[%c0_27, %c0_28, %c0_29, %c0_30] {strides = array<i32: 1, 1, 2, 1>} : memref<1x10x10x64xf32, #tpu.memory_space<vmem>>, vector<1x10x4x64xf32>
    %c0_31 = arith.constant 0 : index
    %c0_32 = arith.constant 0 : index
    %c1_33 = arith.constant 1 : index
    %c0_34 = arith.constant 0 : index
    %20 = tpu.strided_load %arg5[%c0_31, %c0_32, %c1_33, %c0_34] {strides = array<i32: 1, 1, 2, 1>} : memref<1x10x10x64xf32, #tpu.memory_space<vmem>>, vector<1x10x4x64xf32>
    %21 = arith.maximumf %19, %20 : vector<1x10x4x64xf32>
    %c0_35 = arith.constant 0 : index
    %c0_36 = arith.constant 0 : index
    %c2 = arith.constant 2 : index
    %c0_37 = arith.constant 0 : index
    %22 = tpu.strided_load %arg5[%c0_35, %c0_36, %c2, %c0_37] {strides = array<i32: 1, 1, 2, 1>} : memref<1x10x10x64xf32, #tpu.memory_space<vmem>>, vector<1x10x4x64xf32>
    %23 = arith.maximumf %21, %22 : vector<1x10x4x64xf32>
    %c0_38 = arith.constant 0 : index
    %c0_39 = arith.constant 0 : index
    %c0_40 = arith.constant 0 : index
    %c0_41 = arith.constant 0 : index
    %24 = vector.load %arg6[%c0_38, %c0_39, %c0_40, %c0_41] : memref<1x10x4x64xf32, #tpu.memory_space<vmem>>, vector<1x10x4x64xf32>
    tpu.vector_store %arg6[%c0_38, %c0_39, %c0_40, %c0_41], %23 {strides = array<i32>} : memref<1x10x4x64xf32, #tpu.memory_space<vmem>>, vector<1x10x4x64xf32>,
    %c0_42 = arith.constant 0 : index
    %c0_43 = arith.constant 0 : index
    %c0_44 = arith.constant 0 : index
    %c0_45 = arith.constant 0 : index
    %25 = tpu.strided_load %arg6[%c0_42, %c0_43, %c0_44, %c0_45] {strides = array<i32: 1, 2, 1, 1>} : memref<1x10x4x64xf32, #tpu.memory_space<vmem>>, vector<1x4x4x64xf32>
    %c0_46 = arith.constant 0 : index
    %c1_47 = arith.constant 1 : index
    %c0_48 = arith.constant 0 : index
    %c0_49 = arith.constant 0 : index
    %26 = tpu.strided_load %arg6[%c0_46, %c1_47, %c0_48, %c0_49] {strides = array<i32: 1, 2, 1, 1>} : memref<1x10x4x64xf32, #tpu.memory_space<vmem>>, vector<1x4x4x64xf32>
    %27 = arith.maximumf %25, %26 : vector<1x4x4x64xf32>
    %c0_50 = arith.constant 0 : index
    %c2_51 = arith.constant 2 : index
    %c0_52 = arith.constant 0 : index
    %c0_53 = arith.constant 0 : index
    %28 = tpu.strided_load %arg6[%c0_50, %c2_51, %c0_52, %c0_53] {strides = array<i32: 1, 2, 1, 1>} : memref<1x10x4x64xf32, #tpu.memory_space<vmem>>, vector<1x4x4x64xf32>
    %29 = arith.maximumf %27, %28 : vector<1x4x4x64xf32>
    %c0_54 = arith.constant 0 : index
    %c0_55 = arith.constant 0 : index
    %c0_56 = arith.constant 0 : index
    %c0_57 = arith.constant 0 : index
    %30 = vector.load %arg4[%c0_54, %c0_55, %c0_56, %c0_57] : memref<1x4x4x64xf32, #tpu.memory_space<vmem>>, vector<1x4x4x64xf32>
    tpu.vector_store %arg4[%c0_54, %c0_55, %c0_56, %c0_57], %29 {strides = array<i32>} : memref<1x4x4x64xf32, #tpu.memory_space<vmem>>, vector<1x4x4x64xf32>,
    return
  }
  func.func @transform_0(%arg0: i32) -> (i32, i32, i32, i32) {
    %c0_i32 = arith.constant 0 : i32
    %c0_i32_0 = arith.constant 0 : i32
    %c0_i32_1 = arith.constant 0 : i32
    %c0_i32_2 = arith.constant 0 : i32
    return %arg0, %c0_i32, %c0_i32_0, %c0_i32_1 : i32, i32, i32, i32
  }
  func.func @transform_1(%arg0: i32) -> (i32, i32) {
    %c0_i32 = arith.constant 0 : i32
    %c0_i32_0 = arith.constant 0 : i32
    %c0_i32_1 = arith.constant 0 : i32
    return %c0_i32, %c0_i32_0 : i32, i32
  }
  func.func @transform_2(%arg0: i32) -> (i32, i32) {
    %c0_i32 = arith.constant 0 : i32
    %c0_i32_0 = arith.constant 0 : i32
    %c0_i32_1 = arith.constant 0 : i32
    return %c0_i32, %c0_i32_0 : i32, i32
  }
  func.func @transform_3(%arg0: i32) -> (i32, i32, i32, i32) {
    %c0_i32 = arith.constant 0 : i32
    %c0_i32_0 = arith.constant 0 : i32
    %c0_i32_1 = arith.constant 0 : i32
    %c0_i32_2 = arith.constant 0 : i32
    return %arg0, %c0_i32, %c0_i32_0, %c0_i32_1 : i32, i32, i32, i32
  }
}

</mosaic_0001>

<bundles_post_ra>
// kernel: stem_forward.3
= control target key start
LH: loop header
LB: loop body
LE: loop exit
PB: predicated region body
PF: predicated region fallthrough
CT: control target
= control target key end

     0   :  { %8 = vsyncpa [#allocation5], 0  ;;  %s768_s0 = inlined_call_operand.vmem [shape: bf16[2,8,8,64], index: 0, kind: input, shape index: {}]   ;;  %s769_s1 = inlined_call_operand.vmem [shape: f32[1,64], index: 1, kind: input, shape index: {}]   ;;  %s770_s2 = inlined_call_operand.vmem [shape: f32[1,64], index: 2, kind: input, shape index: {}]   ;;  %s771_s3 = inlined_call_operand.hbm [shape: f32[2,4,4,64], index: 3, kind: output, shape index: {}]  }
   0x1   :  { %10 = vsyncpa [#allocation5 + $0x1], 0  ;;  %s617_s12 = smov 0   ;;  %s619_s13 = smov 0  }
   0x2   :  { %s621_s14 = smov 0   ;;  %s623_s15 = smov 0  }
   0x3 LB: > { %s638_s16 = sadd.s32 4294967295, %s591_s15   ;;  %s452_s17 = sadd.s32 4294967294, %s591_s15   ;;  %s591_s15 = sphi %s623_s15, %s777_s15   ;;  %s587_s14 = sphi %s621_s14, %s776_s14   ;;  %s583_s13 = sphi %s619_s13, %s775_s13   ;;  %s579_s12 = sphi %s617_s12, %s774_s12  }
   0x4   : > { %s642_s18 = sadd.s32 1, %s591_s15   ;;  %s91_s19 = sadd.s32 1, %s587_s14 }
   0x5   : > { %s88_s20 = ssub.s32 %s591_s15, %s642_s18  ;;  %p101_p0 = scmp.ne.s32.totalorder %s587_s14, %s583_s13 }
   0x6   : > { %p89_p1 = scmp.eq.s32.totalorder %s88_s20, 0  ;;  %p102_p2 = scmp.eq.s32.totalorder %s638_s16, 1 }
   0x7   : > { %p107_p3 = scmp.ne.s32.totalorder %s583_s13, %s579_s12  ;;  %p108_p4 = scmp.eq.s32.totalorder %s452_s17, 1 }
   0x8   : > { %s653_s21 = scalar_select %p89_p1, %s587_s14, %s91_s19  }
   0x9   : > { %p655_p5 = por %p102_p2, %p101_p0  ;;  %p659_p6 = por %p108_p4, %p107_p3 }
   0xa   : > { %p455_p7 = scmp.ge.s32.totalorder %s591_s15, 1  ;;  %p140_p8 = scmp.lt.s32.totalorder %s591_s15, 3 }
   0xc   : > { %p141_p9 = pnand %p455_p7, %p140_p8 }
   0xd   : > { %vm223_vm0 = vcmask (!%p141_p9), 523264   ;;  %vm230_vm1 = vcmask (!%p141_p9), 516096   ;;  %vm225_vm2 = vcmask (!%p141_p9), 517120   ;;  %p164_p10 = scmp.lt.s32.totalorder (!%p141_p9), %s638_s16, 1  ;;  %v593_v0 = vmov (!%p141_p9), 0.0   ;;  %s161_s6 = sand.u32 (!%p141_p9), 1, %s583_s13  }
   0xe   : > { %144 = sbr.rel (%p141_p9) target bundleno = 84 (0x54), region = 32  ;;  %224 = vst.msk [vmem:[#allocation2] sm:$0xff] (!%p141_p9), %vm223_vm0, %v593_v0  ;;  %228 = vst.msk [vmem:[#allocation2 + $0x90] sm:$0xff] (!%p141_p9), %vm223_vm0, %v593_v0  ;;  %v459_v1 = vld [vmem:[%s769_s1] ss:$0 sm:$0xff] (!%p141_p9)  ;;  %vm339_vm3 = vcmask (!%p141_p9), 519168  }
   0xf   : > { %232 = vst.msk [vmem:[#allocation2 + $0x10] sm:$0x1] (!%p141_p9), %vm230_vm1, %v593_v0  ;;  %233 = vst.msk [vmem:[#allocation2 + $0x20] sm:$0x1] (!%p141_p9), %vm230_vm1, %v593_v0  ;;  %v460_v10 = vld [vmem:[%s770_s2] ss:$0 sm:$0xff] (!%p141_p9) }
  0x10   : > { %234 = vst.msk [vmem:[#allocation2 + $0x30] sm:$0x1] (!%p141_p9), %vm230_vm1, %v593_v0  ;;  %235 = vst.msk [vmem:[#allocation2 + $0x40] sm:$0x1] (!%p141_p9), %vm230_vm1, %v593_v0  ;;  %s702_s7 = sshll.u32 (!%p141_p9), %s161_s6, 4  ;;  %s467_s10 = sshll.u32 (!%p141_p9), %s638_s16, 8 }
  0x11   : > { %236 = vst.msk [vmem:[#allocation2 + $0x50] sm:$0x1] (!%p141_p9), %vm230_vm1, %v593_v0  ;;  %237 = vst.msk [vmem:[#allocation2 + $0x60] sm:$0x1] (!%p141_p9), %vm230_vm1, %v593_v0  ;;  %s163_s8 = scalar_lea.vmem (!%p141_p9), [#allocation4], %s702_s7  ;;  %s722_s19 = scalar_lea.hbm (!%p141_p9), %s771_s3, %s467_s10 }
  0x12   : > { %238 = vst.msk [vmem:[#allocation2 + $0x70] sm:$0x1] (!%p141_p9), %vm230_vm1, %v593_v0  ;;  %239 = vst.msk [vmem:[#allocation2 + $0x80] sm:$0x1] (!%p141_p9), %vm230_vm1, %v593_v0  ;;  %s390_s9 = sshll.u32 (!%p141_p9), %s163_s8, 4  ;;  %s727_s20 = scalar_lea.sflag (!%p141_p9), [#allocation5], %s161_s6  ;;  %s716_s9 = int_to_ptr.vmem [resolvable:$true] %s390_s9 }
  0x13   : > { %226 = vst.msk [vmem:[#allocation2 + $0x8] sm:$0x3] (!%p141_p9), %vm225_vm2, %v593_v0  ;;  %229 = vst.msk [vmem:[#allocation2 + $0x98] sm:$0x3] (!%p141_p9), %vm225_vm2, %v593_v0 }
  0x14   : > { %231 = vst.msk [vmem:[#allocation2] sm:$0x1] (!%p141_p9), %vm230_vm1, %v593_v0  ;;  %240 = vst.msk [vmem:[#allocation2 + $0x90] sm:$0x1] (!%p141_p9), %vm230_vm1, %v593_v0 }
  0x15   : > { %s165_s24 = scalar_select %p164_p10, %s638_s16, 1  ;;  %v280_v23 = vld [vmem:[#allocation2 + $0x1] ss:$2 sm:$0xf] }
  0x16   : > { %s529_s16 = scalar_lea.vmem %s716_s9, 256 }
  0x17   : > { %s466_s25 = sshll.u32 %s165_s24, 5  ;;  %p530_p11 = scmp.ne.s32.totalorder %s716_s9, %s529_s16 }
  0x18   : > { %s168_s28 = scalar_lea.vmem %s768_s0, %s466_s25  ;;  %s594_s24 = smov [#allocation4]  }
  0x19   : > { %v469_v2 = vld [vmem:[%s168_s28] sm:$0xff]   ;;  %v484_v3 = vld [vmem:[%s168_s28 + $0x8] sm:$0xff]   ;;  %v485_v4 = vld [vmem:[%s168_s28 + $0x10] sm:$0xff]   ;;  %p531_p12 = pnand %p530_p11, %p655_p5  ;;  %s533_s25 = sshll.u32 %s594_s24, 4  ;;  %s534_s25 = int_to_ptr.vmem [resolvable:$false] %s533_s25 }
  0x1a   : > { %v470_v5 = vunpack.c.l.bf16 %v469_v2  ;;  %v471_v6 = vunpack.c.h.bf16 %v469_v2  ;;  %v474_v7 = vunpack.c.l.bf16 %v484_v3  ;;  %v475_v8 = vunpack.c.h.bf16 %v484_v3  ;;  %v486_v9 = vld [vmem:[%s168_s28 + $0x18] sm:$0xff]   ;;  %v310_v33 = vld [vmem:[#allocation2 + $0x2] ss:$2 sm:$0xf]  ;;  %s535_s26 = scalar_lea.vmem %s534_s25, 512  ;;  %p536_p0 = scmp.lt.s32.totalorder %s716_s9, %s534_s25 }
  0x1b   : > { %v478_v11 = vunpack.c.l.bf16 %v485_v4  ;;  %v479_v12 = vunpack.c.h.bf16 %v485_v4  ;;  %v482_v13 = vunpack.c.l.bf16 %v486_v9  ;;  %v483_v14 = vunpack.c.h.bf16 %v486_v9  ;;  %v260_v28 = vld [vmem:[#allocation2] ss:$2 sm:$0xf]  ;;  %p532_p13 = pneg %p531_p12  ;;  %p537_p1 = scmp.lt.s32.totalorder %s535_s26, %s529_s16 }
  0x1c   : > { %v193_v15 = vmul.f32 %v470_v5, %v459_v1  ;;  %v194_v16 = vmul.f32 %v471_v6, %v459_v1  ;;  %v195_v17 = vmul.f32 %v474_v7, %v459_v1  ;;  %v196_v18 = vmul.f32 %v475_v8, %v459_v1 }
  0x1d   : > { %v197_v19 = vmul.f32 %v478_v11, %v459_v1  ;;  %v198_v20 = vmul.f32 %v479_v12, %v459_v1  ;;  %v199_v21 = vmul.f32 %v482_v13, %v459_v1  ;;  %v200_v22 = vmul.f32 %v483_v14, %v459_v1  ;;  %p538_p2 = por %p537_p1, %p536_p0 }
  0x1e   : > { %v207_v24 = vadd.f32 %v460_v10, %v193_v15  ;;  %v208_v25 = vadd.f32 %v460_v10, %v194_v16  ;;  %v209_v26 = vadd.f32 %v460_v10, %v195_v17  ;;  %v210_v27 = vadd.f32 %v460_v10, %v196_v18 }
  0x1f   : > { %v211_v29 = vadd.f32 %v460_v10, %v197_v19  ;;  %v212_v30 = vadd.f32 %v460_v10, %v198_v20  ;;  %v213_v31 = vadd.f32 %v460_v10, %v199_v21  ;;  %v214_v32 = vadd.f32 %v460_v10, %v200_v22  ;;  %p539_p3 = pnand %p538_p2, %p532_p13 }
  0x20   : > { %v215_v34 = vmax.f32 %v207_v24, 0.0  ;;  %v216_v35 = vmax.f32 %v208_v25, 0.0  ;;  %v217_v36 = vmax.f32 %v209_v26, 0.0  ;;  %v218_v37 = vmax.f32 %v210_v27, 0.0 }
  0x21   : > { %v219_v38 = vmax.f32 %v211_v29, 0.0  ;;  %v220_v39 = vmax.f32 %v212_v30, 0.0  ;;  %v221_v40 = vmax.f32 %v213_v31, 0.0  ;;  %v222_v41 = vmax.f32 %v214_v32, 0.0 }
  0x22   : > { %252 = vst.msk [vmem:[#allocation2 + $0x11] sm:$0xff] %vm223_vm0, %v215_v34  ;;  %253 = vst.msk [vmem:[#allocation2 + $0x21] sm:$0xff] %vm223_vm0, %v216_v35  ;;  %v299_v42 = vmax.f32 %v260_v28, %v280_v23 }
  0x23   : > { %254 = vst.msk [vmem:[#allocation2 + $0x31] sm:$0xff] %vm223_vm0, %v217_v36  ;;  %255 = vst.msk [vmem:[#allocation2 + $0x41] sm:$0xff] %vm223_vm0, %v218_v37 }
  0x24   : > { %256 = vst.msk [vmem:[#allocation2 + $0x51] sm:$0xff] %vm223_vm0, %v219_v38  ;;  %257 = vst.msk [vmem:[#allocation2 + $0x61] sm:$0xff] %vm223_vm0, %v220_v39  ;;  %v329_v43 = vmax.f32 %v299_v42, %v310_v33 }
  0x25   : > { %258 = vst.msk [vmem:[#allocation2 + $0x71] sm:$0xff] %vm223_vm0, %v221_v40  ;;  %259 = vst.msk [vmem:[#allocation2 + $0x81] sm:$0xff] %vm223_vm0, %v222_v41 }
  0x26   : > { %340 = vst.msk [vmem:[#allocation3] sm:$0xf] %vm339_vm3, %v329_v43 }
  0x29   : > { %v262_v44 = vld [vmem:[#allocation2 + $0x10] ss:$2 sm:$0xf]  ;;  %v282_v45 = vld [vmem:[#allocation2 + $0x11] ss:$2 sm:$0xf] }
  0x2a   : > { %v300_v46 = vmax.f32 %v262_v44, %v282_v45  ;;  %v312_v47 = vld [vmem:[#allocation2 + $0x12] ss:$2 sm:$0xf]  ;;  %v264_v48 = vld [vmem:[#allocation2 + $0x20] ss:$2 sm:$0xf] }
  0x2b   : > { %v284_v49 = vld [vmem:[#allocation2 + $0x21] ss:$2 sm:$0xf]  ;;  %v314_v50 = vld [vmem:[#allocation2 + $0x22] ss:$2 sm:$0xf] }
  0x2c   : > { %v330_v51 = vmax.f32 %v300_v46, %v312_v47  ;;  %v301_v52 = vmax.f32 %v264_v48, %v284_v49  ;;  %v266_v53 = vld [vmem:[#allocation2 + $0x30] ss:$2 sm:$0xf]  ;;  %v286_v54 = vld [vmem:[#allocation2 + $0x31] ss:$2 sm:$0xf] }
  0x2d   : > { %v302_v55 = vmax.f32 %v266_v53, %v286_v54  ;;  %v316_v56 = vld [vmem:[#allocation2 + $0x32] ss:$2 sm:$0xf]  ;;  %v268_v57 = vld [vmem:[#allocation2 + $0x40] ss:$2 sm:$0xf] }
  0x2e   : > { %341 = vst.msk [vmem:[#allocation3 + $0x4] sm:$0xf] %vm339_vm3, %v330_v51  ;;  %v331_v58 = vmax.f32 %v301_v52, %v314_v50  ;;  %v288_v59 = vld [vmem:[#allocation2 + $0x41] ss:$2 sm:$0xf] }
  0x2f   : > { %v318_v60 = vld [vmem:[#allocation2 + $0x42] ss:$2 sm:$0xf]  ;;  %v332_v61 = vmax.f32 %v302_v55, %v316_v56  ;;  %v303_v62 = vmax.f32 %v268_v57, %v288_v59  ;;  %v270_v63 = vld [vmem:[#allocation2 + $0x50] ss:$2 sm:$0xf] }
  0x30   : > { %v290_v0 = vld [vmem:[#allocation2 + $0x51] ss:$2 sm:$0xf]  ;;  %342 = vst.msk [vmem:[#allocation3 + $0x8] sm:$0xf] %vm339_vm3, %v331_v58 }
  0x31   : > { %v304_v1 = vmax.f32 %v270_v63, %v290_v0  ;;  %v320_v2 = vld [vmem:[#allocation2 + $0x52] ss:$2 sm:$0xf]  ;;  %v272_v3 = vld [vmem:[#allocation2 + $0x60] ss:$2 sm:$0xf]  ;;  %v333_v4 = vmax.f32 %v303_v62, %v318_v60 }
  0x32   : > { %343 = vst.msk [vmem:[#allocation3 + $0xc] sm:$0xf] %vm339_vm3, %v332_v61  ;;  %v292_v5 = vld [vmem:[#allocation2 + $0x61] ss:$2 sm:$0xf] }
  0x33   : > { %v322_v6 = vld [vmem:[#allocation2 + $0x62] ss:$2 sm:$0xf]  ;;  %v334_v7 = vmax.f32 %v304_v1, %v320_v2  ;;  %v305_v8 = vmax.f32 %v272_v3, %v292_v5  ;;  %v274_v9 = vld [vmem:[#allocation2 + $0x70] ss:$2 sm:$0xf] }
  0x34   : > { %v294_v10 = vld [vmem:[#allocation2 + $0x71] ss:$2 sm:$0xf]  ;;  %344 = vst.msk [vmem:[#allocation3 + $0x10] sm:$0xf] %vm339_vm3, %v333_v4 }
  0x35   : > { %v306_v11 = vmax.f32 %v274_v9, %v294_v10  ;;  %v324_v12 = vld [vmem:[#allocation2 + $0x72] ss:$2 sm:$0xf]  ;;  %v276_v13 = vld [vmem:[#allocation2 + $0x80] ss:$2 sm:$0xf]  ;;  %v335_v14 = vmax.f32 %v305_v8, %v322_v6 }
  0x36   : > { %345 = vst.msk [vmem:[#allocation3 + $0x14] sm:$0xf] %vm339_vm3, %v334_v7  ;;  %v296_v15 = vld [vmem:[#allocation2 + $0x81] ss:$2 sm:$0xf] }
  0x37   : > { %v326_v16 = vld [vmem:[#allocation2 + $0x82] ss:$2 sm:$0xf]  ;;  %v336_v17 = vmax.f32 %v306_v11, %v324_v12  ;;  %v307_v18 = vmax.f32 %v276_v13, %v296_v15  ;;  %346 = vst.msk [vmem:[#allocation3 + $0x18] sm:$0xf] %vm339_vm3, %v335_v14 }
  0x38   : > { %v350_v19 = vld [vmem:[#allocation3] sm:$0xf]  ;;  %v355_v20 = vld [vmem:[#allocation3 + $0x4] sm:$0xf]  ;;  %v364_v23 = vld [vmem:[#allocation3 + $0x8] sm:$0xf] }
  0x39   : > { %v359_v21 = vmax.f32 %v350_v19, %v355_v20  ;;  %347 = vst.msk [vmem:[#allocation3 + $0x1c] sm:$0xf] %vm339_vm3, %v336_v17  ;;  %v337_v22 = vmax.f32 %v307_v18, %v326_v16  ;;  %v351_v24 = vld [vmem:[#allocation3 + $0x8] sm:$0xf]  ;;  %v356_v26 = vld [vmem:[#allocation3 + $0xc] sm:$0xf] }
  0x3a   : > { %v360_v27 = vmax.f32 %v351_v24, %v356_v26 }
  0x3b   : > { %v368_v25 = vmax.f32 %v359_v21, %v364_v23  ;;  %348 = vst.msk [vmem:[#allocation3 + $0x20] sm:$0xf] %vm339_vm3, %v337_v22  ;;  %v365_v28 = vld [vmem:[#allocation3 + $0x10] sm:$0xf] }
  0x3c   : > { %v352_v29 = vld [vmem:[#allocation3 + $0x10] sm:$0xf]  ;;  %v369_v30 = vmax.f32 %v360_v27, %v365_v28 }
  0x3d   : > { %372 = vst.msk [vmem:[%s163_s8] sm:$0xf] %vm339_vm3, %v368_v25  ;;  %v357_v31 = vld [vmem:[#allocation3 + $0x14] sm:$0xf] }
  0x3e   : > { %v361_v32 = vmax.f32 %v352_v29, %v357_v31  ;;  %373 = vst.msk [vmem:[%s163_s8 + $0x4] sm:$0xf] %vm339_vm3, %v369_v30  ;;  %v366_v33 = vld [vmem:[#allocation3 + $0x18] sm:$0xf] }
  0x3f   : > { %v353_v34 = vld [vmem:[#allocation3 + $0x18] sm:$0xf] }
  0x40   : > { %v370_v35 = vmax.f32 %v361_v32, %v366_v33  ;;  %v358_v36 = vld [vmem:[#allocation3 + $0x1c] sm:$0xf] }
  0x41   : > { %v362_v37 = vmax.f32 %v353_v34, %v358_v36 }
  0x42   : > { %374 = vst.msk [vmem:[%s163_s8 + $0x8] sm:$0xf] %vm339_vm3, %v370_v35  ;;  %v367_v38 = vld [vmem:[#allocation3 + $0x20] sm:$0xf] }
  0x43   : > { %v371_v39 = vmax.f32 %v362_v37, %v367_v38 }
  0x45   : > { %375 = vst.msk [vmem:[%s163_s8 + $0xc] sm:$0xf] %vm339_vm3, %v371_v39 }
  0x46   : > { %542 = shalt.err (!%p539_p3)
}
  0x47   : > { %s543_s27 = scalar_lea.hbm %s722_s19, 256  ;;  %s547_s30 = scalar_lea.hbm %s771_s3, 512 }
  0x48   : > { %p544_p4 = scmp.ne.s32.totalorder %s722_s19, %s543_s27  ;;  %p548_p9 = scmp.lt.u32.totalorder %s722_s19, %s771_s3 }
  0x49   : > { %p549_p10 = scmp.lt.u32.totalorder %s547_s30, %s543_s27  ;;  %p551_p12 = scmp.lt.u32.totalorder %s543_s27, %s722_s19 }
  0x4a   : > { %p545_p7 = pnand %p544_p4, %p655_p5 }
  0x4b   : > { %p550_p11 = por %p549_p10, %p548_p9 }
  0x4c   : > { %p546_p8 = pneg %p545_p7 }
  0x4d   : > { %p552_p13 = por %p551_p12, %p550_p11 }
  0x4f   : > { %p553_p0 = pnand %p552_p13, %p546_p8 }
  0x51   : > { %556 = shalt.err (!%p553_p0)
}
  0x52   : > { %s595_s6 = smov 64   ;;  %s596_s7 = smov 4  }
  0x53   : > { %487 = dma.vmem_to_hbm [thread:$0]  (%p655_p5), %s716_s9, 256, %s722_s19, %s727_s20, %s595_s6, %s595_s6, %s596_s7  }
  0x54 PF: > { %p493_p1 = scmp.ge.s32.totalorder %s591_s15, 2  ;;  %s405_s8 = sand.u32 1, %s579_s12  }
  0x55   : > { %s406_s10 = scalar_lea.sflag [#allocation5], %s405_s8 }
  0x56   : > { %p490_p2 = pnand %p493_p1, %p659_p6 }
  0x58   : > { %574 = dma.done.wait (!%p490_p2), %s406_s10, 256  }
  0x59   : > { %576 = vsyncadd (!%p490_p2), %s406_s10, 4294967040  ;;  %p13_p3 = scmp.ge.s32.totalorder %s642_s18, 4   ;;  %s774_s12 = smov %s583_s13 }
  0x5a   : > { %s775_s13 = smov %s587_s14  ;;  %s776_s14 = smov %s653_s21 }
  0x5b   : > { %s777_s15 = smov %s642_s18  ;;  %15 = sbr.rel (!%p13_p3) target bundleno = 3 (0x3), region = 100 }
  0x62   :  { %411 = vsyncpa [#allocation5], 1 }
  0x63   :  { %413 = vsyncpa [#allocation5 + $0x1], 1 }

// kernel: stem_forward.2
= control target key start
LH: loop header
LB: loop body
LE: loop exit
PB: predicated region body
PF: predicated region fallthrough
CT: control target
= control target key end

     0   :  { %v617_v0 = vmov 0   ;;  %vm179_vm0 = vcmask 154624   ;;  %vm204_vm1 = vcmask 1040384   ;;  %vm205_vm2 = vcmask 1041408   ;;  %s874_s1 = inlined_call_operand.vmem [shape: bf16[147,64], index: 1, kind: input, shape index: {}]   ;;  %s875_s0 = inlined_call_operand.vmem [shape: bf16[128,147], index: 0, kind: input, shape index: {}]   ;;  %s876_s2 = inlined_call_operand.vmem [shape: bf16[128,64], index: 2, kind: output, shape index: {0}]   ;;  %s877_s3 = inlined_call_operand.vmem [shape: f32[1,1,64], index: 3, kind: output, shape index: {1}]   ;;  %s878_s4 = inlined_call_operand.vmem [shape: f32[1,1,64], index: 4, kind: output, shape index: {2}]  }
   0x1   :  { %211 = vmatprep.subr.bf16.mxu0 %v617_v0  ;;  %v583_v1 = vld [vmem:[%s874_s1] sm:$0xff]   ;;  %561 = vmatprep.subr.bf16.mxu1 %v617_v0  ;;  %v584_v2 = vld [vmem:[%s874_s1 + $0x8] sm:$0xff]   ;;  %v585_v3 = vld [vmem:[%s874_s1 + $0x10] sm:$0xff]   ;;  %v618_v11 = vmov 65535   ;;  %vm372_vm3 = vcmask 519168   ;;  %vm389_vm4 = vcmask 523264  }
   0x2   :  { %212 = vmatpush1.bf16.msra.mxu0 %v583_v1  ;;  %571 = vmatpush1.bf16.msra.mxu1 %v583_v1  ;;  %v586_v4 = vld [vmem:[%s874_s1 + $0x18] sm:$0xff]   ;;  %v595_v5 = vld [vmem:[%s875_s0 + $0x4] ss:$8 sps:$4 sm:$0xff]   ;;  %v589_v9 = vld [vmem:[%s874_s1 + $0x30] sm:$0xff]   ;;  %v206_v12 = vsel %vm204_vm1, 4294967295, %v618_v11  ;;  %vm427_vm5 = vcmask 516096  }
   0x3   :  { %213 = vmatprep.subr.bf16.mxu0 %v617_v0  ;;  %562 = vmatprep.subr.bf16.mxu1 %v617_v0  ;;  %v601_v6 = vld [vmem:[%s875_s0 + $0x44] ss:$8 sps:$4 sm:$0xff]   ;;  %v590_v10 = vld [vmem:[%s874_s1 + $0x38] sm:$0xff]   ;;  %v592_v14 = vld [vmem:[%s874_s1 + $0x48] ss:$0 sps:$4 sm:$0x33]  }
   0x4   :  { %521 = vmatprep.mubr.msk.bf16.mxu0 %vm179_vm0, %v595_v5  ;;  %v587_v7 = vld [vmem:[%s874_s1 + $0x20] sm:$0xff]   ;;  %525 = vmatprep.mubr.msk.bf16.mxu1 %vm179_vm0, %v601_v6  ;;  %v588_v8 = vld [vmem:[%s874_s1 + $0x28] sm:$0xff]   ;;  %v207_v15 = vsel %vm205_vm2, %v206_v12, 0  ;;  %v596_v19 = vld [vmem:[%s875_s0 + $0x14] ss:$8 sps:$4 sm:$0xff]  }
   0x5   :  { %v591_v13 = vld [vmem:[%s874_s1 + $0x40] sm:$0xff]   ;;  %v209_v16 = vand.u32 %v592_v14, %v207_v15  ;;  %v605_v20 = vld [vmem:[%s875_s0 + $0x54] ss:$8 sps:$4 sm:$0xff]   ;;  %v598_v21 = vld [vmem:[%s875_s0 + $0x10] ss:$8 sps:$4 sm:$0xff]  }
   0x6   :  { %214 = vmatpush1.bf16.msra.mxu0 %v584_v2  ;;  %572 = vmatpush1.bf16.msra.mxu1 %v584_v2  ;;  %v593_v17 = vld [vmem:[%s875_s0] ss:$8 sps:$4 sm:$0xff]   ;;  %v607_v22 = vld [vmem:[%s875_s0 + $0x50] ss:$8 sps:$4 sm:$0xff]   ;;  %v602_v23 = vld [vmem:[%s875_s0 + $0x24] ss:$8 sps:$4 sm:$0xff]  }
   0x7   :  { %215 = vmatprep.subr.bf16.mxu0 %v617_v0  ;;  %563 = vmatprep.subr.bf16.mxu1 %v617_v0  ;;  %v599_v18 = vld [vmem:[%s875_s0 + $0x40] ss:$8 sps:$4 sm:$0xff]   ;;  %v611_v24 = vld [vmem:[%s875_s0 + $0x64] ss:$8 sps:$4 sm:$0xff]   ;;  %v608_v27 = vld [vmem:[%s875_s0 + $0x34] ss:$8 sps:$4 sm:$0xff]  }
   0x8   :  { %v604_v25 = vld [vmem:[%s875_s0 + $0x20] ss:$8 sps:$4 sm:$0xff]   ;;  %v614_v28 = vld [vmem:[%s875_s0 + $0x74] ss:$8 sps:$4 sm:$0xff]   ;;  %v610_v29 = vld [vmem:[%s875_s0 + $0x30] ss:$8 sps:$4 sm:$0xff]  }
   0x9   :  { %v613_v26 = vld [vmem:[%s875_s0 + $0x60] ss:$8 sps:$4 sm:$0xff]   ;;  %v616_v30 = vld [vmem:[%s875_s0 + $0x70] ss:$8 sps:$4 sm:$0xff]  }
   0xa   :  { %216 = vmatpush1.bf16.msra.mxu0 %v585_v3  ;;  %573 = vmatpush1.bf16.msra.mxu1 %v585_v3 }
   0xb   :  { %217 = vmatprep.subr.bf16.mxu0 %v617_v0  ;;  %564 = vmatprep.subr.bf16.mxu1 %v617_v0 }
   0xe   :  { %218 = vmatpush1.bf16.msra.mxu0 %v586_v4  ;;  %574 = vmatpush1.bf16.msra.mxu1 %v586_v4 }
   0xf   :  { %219 = vmatprep.subr.bf16.mxu0 %v617_v0  ;;  %565 = vmatprep.subr.bf16.mxu1 %v617_v0 }
  0x12   :  { %220 = vmatpush1.bf16.msra.mxu0 %v587_v7  ;;  %575 = vmatpush1.bf16.msra.mxu1 %v587_v7 }
  0x13   :  { %221 = vmatprep.subr.bf16.mxu0 %v617_v0  ;;  %566 = vmatprep.subr.bf16.mxu1 %v617_v0 }
  0x16   :  { %222 = vmatpush1.bf16.msra.mxu0 %v588_v8  ;;  %576 = vmatpush1.bf16.msra.mxu1 %v588_v8 }
  0x17   :  { %223 = vmatprep.subr.bf16.mxu0 %v617_v0  ;;  %567 = vmatprep.subr.bf16.mxu1 %v617_v0 }
  0x1a   :  { %224 = vmatpush1.bf16.msra.mxu0 %v589_v9  ;;  %577 = vmatpush1.bf16.msra.mxu1 %v589_v9 }
  0x1b   :  { %225 = vmatprep.subr.bf16.mxu0 %v617_v0  ;;  %568 = vmatprep.subr.bf16.mxu1 %v617_v0 }
  0x1e   :  { %226 = vmatpush1.bf16.msra.mxu0 %v590_v10  ;;  %578 = vmatpush1.bf16.msra.mxu1 %v590_v10 }
  0x1f   :  { %227 = vmatprep.subr.bf16.mxu0 %v617_v0  ;;  %569 = vmatprep.subr.bf16.mxu1 %v617_v0 }
  0x22   :  { %228 = vmatpush1.bf16.msra.mxu0 %v591_v13  ;;  %579 = vmatpush1.bf16.msra.mxu1 %v591_v13 }
  0x23   :  { %229 = vmatprep.subr.bf16.mxu0 %v617_v0  ;;  %570 = vmatprep.subr.bf16.mxu1 %v617_v0 }
  0x26   :  { %230 = vmatpush1.bf16.msra.mxu0 %v209_v16  ;;  %580 = vmatpush1.bf16.msra.mxu1 %v209_v16 }
  0x29   :  { %244 = vmatmul.mubr.bf16.vlgmr.msra.gmra.mrb[0].mxu0 %v593_v17  ;;  %276 = vmatmul.mubr.bf16.vlgmr.msra.gmra.mrb[0].mxu1 %v599_v18 }
  0x2a   :  { %522 = vmatprep.mubr.msk.bf16.mxu0 %vm179_vm0, %v596_v19  ;;  %526 = vmatprep.mubr.msk.bf16.mxu1 %vm179_vm0, %v605_v20 }
  0x31   :  { %252 = vmatmul.mubr.bf16.gmra.mrb[4].mxu0 %v598_v21  ;;  %284 = vmatmul.mubr.bf16.gmra.mrb[4].mxu1 %v607_v22 }
  0x32   :  { %523 = vmatprep.mubr.msk.bf16.mxu0 %vm179_vm0, %v602_v23  ;;  %527 = vmatprep.mubr.msk.bf16.mxu1 %vm179_vm0, %v611_v24 }
  0x39   :  { %260 = vmatmul.mubr.bf16.gmra.mrb[8].mxu0 %v604_v25  ;;  %292 = vmatmul.mubr.bf16.gmra.mrb[8].mxu1 %v613_v26 }
  0x3a   :  { %524 = vmatprep.mubr.msk.bf16.mxu0 %vm179_vm0, %v608_v27  ;;  %528 = vmatprep.mubr.msk.bf16.mxu1 %vm179_vm0, %v614_v28 }
  0x41   :  { %268 = vmatmul.mubr.bf16.gmra.mrb[12].mxu0 %v610_v29  ;;  %300 = vmatmul.mubr.bf16.gmra.mrb[12].mxu1 %v616_v30 }
  0xfc   :  { %v245_v31 = vpop.f32.mrb[0].mxu0  ;;  %v730_v32 = vpop.f32.mrb[0].mxu1 }
  0xfd   :  { %v545_v33 = vpack.c.bf16 %v245_v31, %v245_v31  ;;  %v429_v34 = vmul.f32 %v245_v31, %v245_v31  ;;  %v247_v35 = vpop.f32.mrb[1].mxu0  ;;  %v553_v36 = vpack.c.bf16 %v730_v32, %v730_v32  ;;  %v279_v37 = vpop.f32.mrb[1].mxu1  ;;  %v390_v40 = vsel %vm389_vm4, %v245_v31, 0.0 }
  0xfe   :  { %v248_v38 = vpop.f32.mrb[2].mxu0  ;;  %v734_v39 = vpop.f32.mrb[2].mxu1 }
  0xff   :  { %373 = vst.msk [vmem:[%s876_s2] sm:$0xf] %vm372_vm3, %v545_v33  ;;  %v546_v41 = vpack.c.bf16 %v248_v38, %v248_v38  ;;  %v391_v42 = vsel %vm389_vm4, %v248_v38, 0.0  ;;  %v430_v43 = vmul.f32 %v248_v38, %v248_v38  ;;  %v250_v44 = vpop.f32.mrb[3].mxu0  ;;  %381 = vst.msk [vmem:[%s876_s2 + $0x20] sm:$0xf] %vm372_vm3, %v553_v36  ;;  %v554_v47 = vpack.c.bf16 %v734_v39, %v734_v39 }
 0x100   :  { %v282_v45 = vpop.f32.mrb[3].mxu1  ;;  %v392_v46 = vadd.f32 %v391_v42, %v390_v40  ;;  %v445_v48 = vsel %vm389_vm4, %v429_v34, 0.0 }
 0x101   :  { %374 = vst.msk [vmem:[%s876_s2 + $0x4] sm:$0xf] %vm372_vm3, %v546_v41  ;;  %v446_v49 = vsel %vm389_vm4, %v430_v43, 0.0  ;;  %382 = vst.msk [vmem:[%s876_s2 + $0x24] sm:$0xf] %vm372_vm3, %v554_v47  ;;  %v437_v41 = vmul.f32 %v730_v32, %v730_v32 }
 0x102   :  { %v447_v50 = vadd.f32 %v446_v49, %v445_v48 }
 0x104   :  { %v253_v51 = vpop.f32.mrb[4].mxu0  ;;  %v758_v52 = vpop.f32.mrb[4].mxu1 }
 0x105   :  { %v547_v53 = vpack.c.bf16 %v253_v51, %v253_v51  ;;  %v393_v54 = vsel %vm389_vm4, %v253_v51, 0.0  ;;  %v431_v55 = vmul.f32 %v253_v51, %v253_v51  ;;  %v255_v56 = vpop.f32.mrb[5].mxu0  ;;  %v555_v57 = vpack.c.bf16 %v758_v52, %v758_v52  ;;  %v287_v58 = vpop.f32.mrb[5].mxu1 }
 0x106   :  { %v394_v59 = vadd.f32 %v393_v54, %v392_v46  ;;  %v256_v60 = vpop.f32.mrb[6].mxu0  ;;  %v763_v61 = vpop.f32.mrb[6].mxu1  ;;  %v438_v56 = vmul.f32 %v734_v39, %v734_v39 }
 0x107   :  { %375 = vst.msk [vmem:[%s876_s2 + $0x8] sm:$0xf] %vm372_vm3, %v547_v53  ;;  %v448_v62 = vsel %vm389_vm4, %v431_v55, 0.0  ;;  %v548_v63 = vpack.c.bf16 %v256_v60, %v256_v60  ;;  %v395_v0 = vsel %vm389_vm4, %v256_v60, 0.0  ;;  %v432_v1 = vmul.f32 %v256_v60, %v256_v60  ;;  %v258_v2 = vpop.f32.mrb[7].mxu0  ;;  %v290_v3 = vpop.f32.mrb[7].mxu1 }
 0x108   :  { %383 = vst.msk [vmem:[%s876_s2 + $0x28] sm:$0xf] %vm372_vm3, %v555_v57  ;;  %v449_v4 = vadd.f32 %v448_v62, %v447_v50  ;;  %v396_v5 = vadd.f32 %v395_v0, %v394_v59  ;;  %v556_v6 = vpack.c.bf16 %v763_v61, %v763_v61  ;;  %v405_v55 = vsel %vm389_vm4, %v730_v32, 0.0 }
 0x109   :  { %376 = vst.msk [vmem:[%s876_s2 + $0xc] sm:$0xf] %vm372_vm3, %v548_v63  ;;  %v450_v7 = vsel %vm389_vm4, %v432_v1, 0.0  ;;  %v460_v60 = vsel %vm389_vm4, %v437_v41, 0.0  ;;  %v407_v32 = vsel %vm389_vm4, %v734_v39, 0.0  ;;  %v439_v62 = vmul.f32 %v758_v52, %v758_v52 }
 0x10a   :  { %v451_v8 = vadd.f32 %v450_v7, %v449_v4  ;;  %384 = vst.msk [vmem:[%s876_s2 + $0x2c] sm:$0xf] %vm372_vm3, %v556_v6  ;;  %v462_v1 = vsel %vm389_vm4, %v438_v56, 0.0  ;;  %v409_v2 = vsel %vm389_vm4, %v758_v52, 0.0  ;;  %v440_v3 = vmul.f32 %v763_v61, %v763_v61 }
 0x10b   :  { %v464_v6 = vsel %vm389_vm4, %v439_v62, 0.0  ;;  %v411_v39 = vsel %vm389_vm4, %v763_v61, 0.0 }
 0x10c   :  { %v261_v9 = vpop.f32.mrb[8].mxu0  ;;  %v786_v10 = vpop.f32.mrb[8].mxu1 }
 0x10d   :  { %v549_v11 = vpack.c.bf16 %v261_v9, %v261_v9  ;;  %v397_v12 = vsel %vm389_vm4, %v261_v9, 0.0  ;;  %v433_v13 = vmul.f32 %v261_v9, %v261_v9  ;;  %v263_v14 = vpop.f32.mrb[9].mxu0  ;;  %v557_v15 = vpack.c.bf16 %v786_v10, %v786_v10  ;;  %v295_v16 = vpop.f32.mrb[9].mxu1 }
 0x10e   :  { %v398_v17 = vadd.f32 %v397_v12, %v396_v5  ;;  %v264_v18 = vpop.f32.mrb[10].mxu0  ;;  %v791_v19 = vpop.f32.mrb[10].mxu1  ;;  %v441_v7 = vmul.f32 %v786_v10, %v786_v10  ;;  %v413_v52 = vsel %vm389_vm4, %v786_v10, 0.0 }
 0x10f   :  { %377 = vst.msk [vmem:[%s876_s2 + $0x10] sm:$0xf] %vm372_vm3, %v549_v11  ;;  %v452_v20 = vsel %vm389_vm4, %v433_v13, 0.0  ;;  %v550_v21 = vpack.c.bf16 %v264_v18, %v264_v18  ;;  %v399_v22 = vsel %vm389_vm4, %v264_v18, 0.0  ;;  %v434_v23 = vmul.f32 %v264_v18, %v264_v18  ;;  %v266_v24 = vpop.f32.mrb[11].mxu0  ;;  %v298_v25 = vpop.f32.mrb[11].mxu1 }
 0x110   :  { %385 = vst.msk [vmem:[%s876_s2 + $0x30] sm:$0xf] %vm372_vm3, %v557_v15  ;;  %v453_v26 = vadd.f32 %v452_v20, %v451_v8  ;;  %v400_v27 = vadd.f32 %v399_v22, %v398_v17  ;;  %v558_v28 = vpack.c.bf16 %v791_v19, %v791_v19  ;;  %v466_v11 = vsel %vm389_vm4, %v440_v3, 0.0 }
 0x111   :  { %378 = vst.msk [vmem:[%s876_s2 + $0x14] sm:$0xf] %vm372_vm3, %v550_v21  ;;  %v454_v29 = vsel %vm389_vm4, %v434_v23, 0.0  ;;  %v442_v12 = vmul.f32 %v791_v19, %v791_v19  ;;  %v468_v16 = vsel %vm389_vm4, %v441_v7, 0.0  ;;  %v415_v61 = vsel %vm389_vm4, %v791_v19, 0.0 }
 0x112   :  { %v455_v30 = vadd.f32 %v454_v29, %v453_v26  ;;  %386 = vst.msk [vmem:[%s876_s2 + $0x34] sm:$0xf] %vm372_vm3, %v558_v28 }
 0x113   :  { %v470_v21 = vsel %vm389_vm4, %v442_v12, 0.0 }
 0x114   :  { %v269_v31 = vpop.f32.mrb[12].mxu0  ;;  %v301_v33 = vpop.f32.mrb[12].mxu1 }
 0x115   :  { %v551_v34 = vpack.c.bf16 %v269_v31, %v269_v31  ;;  %v401_v35 = vsel %vm389_vm4, %v269_v31, 0.0  ;;  %v435_v36 = vmul.f32 %v269_v31, %v269_v31  ;;  %v271_v37 = vpop.f32.mrb[13].mxu0  ;;  %v559_v38 = vpack.c.bf16 %v301_v33, %v301_v33  ;;  %v303_v40 = vpop.f32.mrb[13].mxu1 }
 0x116   :  { %v402_v42 = vadd.f32 %v401_v35, %v400_v27  ;;  %v272_v43 = vpop.f32.mrb[14].mxu0  ;;  %v304_v44 = vpop.f32.mrb[14].mxu1  ;;  %v443_v13 = vmul.f32 %v301_v33, %v301_v33  ;;  %v417_v17 = vsel %vm389_vm4, %v301_v33, 0.0 }
 0x117   :  { %379 = vst.msk [vmem:[%s876_s2 + $0x18] sm:$0xf] %vm372_vm3, %v551_v34  ;;  %v456_v45 = vsel %vm389_vm4, %v435_v36, 0.0  ;;  %v552_v46 = vpack.c.bf16 %v272_v43, %v272_v43  ;;  %v403_v47 = vsel %vm389_vm4, %v272_v43, 0.0  ;;  %v436_v48 = vmul.f32 %v272_v43, %v272_v43  ;;  %v274_v49 = vpop.f32.mrb[15].mxu0  ;;  %v306_v50 = vpop.f32.mrb[15].mxu1 }
 0x118   :  { %387 = vst.msk [vmem:[%s876_s2 + $0x38] sm:$0xf] %vm372_vm3, %v559_v38  ;;  %v457_v51 = vadd.f32 %v456_v45, %v455_v30  ;;  %v404_v53 = vadd.f32 %v403_v47, %v402_v42  ;;  %v560_v54 = vpack.c.bf16 %v304_v44, %v304_v44  ;;  %v472_v22 = vsel %vm389_vm4, %v443_v13, 0.0 }
 0x119   :  { %380 = vst.msk [vmem:[%s876_s2 + $0x1c] sm:$0xf] %vm372_vm3, %v552_v46  ;;  %v458_v57 = vsel %vm389_vm4, %v436_v48, 0.0  ;;  %v444_v10 = vmul.f32 %v304_v44, %v304_v44  ;;  %v419_v25 = vsel %vm389_vm4, %v304_v44, 0.0 }
 0x11a   :  { %v406_v58 = vadd.f32 %v405_v55, %v404_v53  ;;  %v459_v59 = vadd.f32 %v458_v57, %v457_v51  ;;  %388 = vst.msk [vmem:[%s876_s2 + $0x3c] sm:$0xf] %vm372_vm3, %v560_v54 }
 0x11b   :  { %v474_v28 = vsel %vm389_vm4, %v444_v10, 0.0 }
 0x11c   :  { %v408_v63 = vadd.f32 %v407_v32, %v406_v58  ;;  %v461_v0 = vadd.f32 %v460_v60, %v459_v59 }
 0x11e   :  { %v463_v4 = vadd.f32 %v462_v1, %v461_v0  ;;  %v410_v5 = vadd.f32 %v409_v2, %v408_v63 }
 0x120   :  { %v412_v8 = vadd.f32 %v411_v39, %v410_v5  ;;  %v465_v9 = vadd.f32 %v464_v6, %v463_v4 }
 0x122   :  { %v414_v14 = vadd.f32 %v413_v52, %v412_v8  ;;  %v467_v15 = vadd.f32 %v466_v11, %v465_v9 }
 0x124   :  { %v469_v18 = vadd.f32 %v468_v16, %v467_v15  ;;  %v416_v20 = vadd.f32 %v415_v61, %v414_v14 }
 0x126   :  { %v471_v23 = vadd.f32 %v470_v21, %v469_v18  ;;  %v418_v24 = vadd.f32 %v417_v17, %v416_v20 }
 0x128   :  { %v473_v26 = vadd.f32 %v472_v22, %v471_v23  ;;  %v420_v27 = vadd.f32 %v419_v25, %v418_v24 }
 0x12a   :  { %v421_v29 = vrot.slane %v420_v27, 4  ;;  %v475_v30 = vadd.f32 %v474_v28, %v473_v26 }
 0x12c   :  { %v422_v19 = vadd.f32 %v421_v29, %v420_v27  ;;  %v476_v31 = vrot.slane %v475_v30, 4 }
 0x12e   :  { %v423_v33 = vrot.slane %v422_v19, 2  ;;  %v477_v34 = vadd.f32 %v476_v31, %v475_v30 }
 0x130   :  { %v424_v35 = vadd.f32 %v423_v33, %v422_v19  ;;  %v478_v36 = vrot.slane %v477_v34, 2 }
 0x132   :  { %v425_v37 = vrot.slane %v424_v35, 1  ;;  %v479_v38 = vadd.f32 %v478_v36, %v477_v34 }
 0x134   :  { %v426_v40 = vadd.f32 %v425_v37, %v424_v35  ;;  %v480_v41 = vrot.slane %v479_v38, 1 }
 0x136   :  { %428 = vst.msk [vmem:[%s877_s3] sm:$0x1] %vm427_vm5, %v426_v40  ;;  %v481_v42 = vadd.f32 %v480_v41, %v479_v38 }
 0x138   :  { %482 = vst.msk [vmem:[%s878_s4] sm:$0x1] %vm427_vm5, %v481_v42 }

</bundles_post_ra>
